<compile_context>
chip_gen: v7x
topology: tpu7x:2x2x1
jax: 0.10.0
libtpu: 0.0.40
codegen_flags: <defaults>
</compile_context>

<pallas_src>
import functools

import jax
import jax.numpy as jnp
from jax.experimental import pallas as pl
from jax.experimental.pallas import tpu as pltpu


# ----------------------------------------------------------------------------
# Kernel
# ----------------------------------------------------------------------------
def _make_low_rank_kernel(has_bias):
    """Grid is (i, k, j) = (row tiles, in_features tiles, out_features tiles).

    t_ref is a persistent (block_m, rank) f32 scratch:
      * zeroed at the first (k, j) step of each row tile,
      * accumulated with x[i, k] @ w0[k] only at j == 0 (no recompute per N tile),
      * consumed by the second matmul (t @ w1[j] + bias[j]) at the last K step.
    """

    def kernel(x_ref, w0_ref, w1_ref, *rest):
        if has_bias:
            b_ref, o_ref, t_ref = rest
        else:
            o_ref, t_ref = rest
            b_ref = None

        k = pl.program_id(1)
        j = pl.program_id(2)
        nk = pl.num_programs(1)

        @pl.when(jnp.logical_and(k == 0, j == 0))
        def _():
            t_ref[...] = jnp.zeros_like(t_ref)

        @pl.when(j == 0)
        def _():
            t_ref[...] += jnp.dot(
                x_ref[...], w0_ref[...], preferred_element_type=jnp.float32)

        @pl.when(k == nk - 1)
        def _():
            t = t_ref[...]
            if w1_ref.dtype != jnp.float32:
                # Keep the MXU in its fast low-precision mode for the second
                # matmul; accumulation still happens in f32.
                t = t.astype(w1_ref.dtype)
            y = jnp.dot(t, w1_ref[...], preferred_element_type=jnp.float32)
            if b_ref is not None:
                y = y + b_ref[...].astype(jnp.float32)
            o_ref[...] = y.astype(o_ref.dtype)

    return kernel


# ----------------------------------------------------------------------------
# Tiling / VMEM budgeting
# ----------------------------------------------------------------------------
def _round_up(a, b):
    return ((a + b - 1) // b) * b


def _sublane(dtype):
    # Minimum sublane multiple: 8 rows (f32), 16 (bf16), 32 (int8/fp8).
    return max(8, 32 // jnp.dtype(dtype).itemsize)


def _padded_bytes(rows, cols, dtype):
    # Physical VMEM footprint including (sublane, 128) layout padding.
    it = jnp.dtype(dtype).itemsize
    return (_round_up(max(int(rows), 1), _sublane(dtype))
            * _round_up(max(int(cols), 1), 128) * it)


_VMEM_CAPACITY_CACHE = None


def _vmem_capacity_bytes():
    """Generation-aware VMEM capacity (v7x: 64 MiB, v5e/v6e: 128 MiB)."""
    global _VMEM_CAPACITY_CACHE
    if _VMEM_CAPACITY_CACHE is None:
        cap = 0
        try:
            cap = int(getattr(pltpu.get_tpu_info(), "vmem_capacity_bytes", 0) or 0)
        except Exception:
            cap = 0
        _VMEM_CAPACITY_CACHE = cap if cap > 0 else 64 * 1024 * 1024  # v7x-safe
    return _VMEM_CAPACITY_CACHE


def _choose_tiles(m, in_features, out_features, rank, x_dtype, w_dtype,
                  has_bias, block_m, block_n, block_k, budget):
    sub = _sublane(x_dtype)
    auto_m = block_m is None
    auto_n = block_n is None
    auto_k = block_k is None

    def total_bytes(bm, bk, bn):
        total = 2 * _padded_bytes(bm, bk, x_dtype)       # x tile   (double-buffered)
        total += 2 * _padded_bytes(bm, bn, x_dtype)      # out tile (double-buffered)
        # TODO(synk): w0 / bias never change block index along i; a
        # pipeline_mode=pl.Buffered(1) spec would drop one buffer each.
        total += 2 * _padded_bytes(bk, rank, w_dtype)    # w0 (rank pads to 128 lanes)
        total += 2 * _padded_bytes(rank, bn, w_dtype)    # w1
        if has_bias:
            total += 2 * _padded_bytes(1, bn, w_dtype)   # bias (1 -> 8 sublanes)
        total += _padded_bytes(bm, rank, jnp.float32)    # t scratch (single buffer)
        return total

    # ---- row (M / sublane) tile --------------------------------------------
    if auto_m:
        block_m = min(512, _round_up(m, sub))
    else:
        block_m = max(sub, _round_up(block_m, sub))

    # ---- contraction (K / in_features) tile --------------------------------
    if auto_k:
        block_k = in_features
        # K-tile when the x row-slab alone would eat most of the budget, so
        # block_m stays large instead of collapsing toward the 8-row floor.
        if (2 * _padded_bytes(block_m, in_features, x_dtype) > budget // 2
                and in_features % 256 == 0 and in_features >= 1024):
            while (total_bytes(block_m, block_k, out_features) > budget
                   and block_k % 256 == 0 and block_k >= 1024):
                block_k //= 2
    elif block_k != in_features:
        block_k = min(_round_up(block_k, 128), in_features)
        if block_k <= 0 or in_features % block_k != 0:
            # A ragged trailing K block would fold padding garbage into the
            # accumulation -- fall back to the full contraction.
            block_k = in_features

    # ---- lane (N / out_features) tile --------------------------------------
    if block_k != in_features:
        # K tiling requires an untiled N axis so every output block is written
        # exactly once (never revisited across the k axis).
        block_n = out_features
    elif auto_n:
        if out_features <= 2048 or out_features % 128 != 0:
            block_n = out_features
        else:
            block_n = 2048
    elif block_n != out_features:
        block_n = _round_up(block_n, 128)
        if block_n >= out_features:
            block_n = out_features

    # ---- fit to the VMEM budget --------------------------------------------
    while total_bytes(block_m, block_k, block_n) > budget and block_m > sub:
        block_m = max(sub, _round_up(block_m // 2, sub))
    if block_k == in_features:
        while (total_bytes(block_m, block_k, block_n) > budget
               and block_n > 128 and block_n % 128 == 0):
            block_n = max(128, _round_up(block_n // 2, 128))

    # v7x has two TensorCores: give the "parallel" row axis >= 2 grid steps.
    if auto_m and pl.cdiv(m, block_m) == 1 and m >= 2 * sub:
        block_m = max(sub, _round_up(pl.cdiv(m, 2), sub))

    return block_m, block_k, block_n, total_bytes(block_m, block_k, block_n)


# ----------------------------------------------------------------------------
# Wrapper
# ----------------------------------------------------------------------------
@functools.partial(jax.jit, static_argnames=("block_m", "block_n", "block_k"))
def low_rank_linear(x, w0, w1, bias=None, *, block_m=None, block_n=None,
                    block_k=None):
    """y = (x @ w0) @ w1 (+ bias), matching LowRankLinear.forward."""
    in_features, rank = w0.shape
    rank_1, out_features = w1.shape
    assert rank == rank_1
    assert x.shape[-1] == in_features

    lead = x.shape[:-1]
    m = 1
    for d in lead:
        m *= d
    x2 = x.reshape(m, in_features)
    has_bias = bias is not None

    capacity = _vmem_capacity_bytes()
    budget = int(capacity * 0.6)

    block_m, block_k, block_n, tile_total = _choose_tiles(
        m, in_features, out_features, rank, x.dtype, w0.dtype,
        has_bias, block_m, block_n, block_k, budget)

    grid = (pl.cdiv(m, block_m),
            pl.cdiv(in_features, block_k),
            pl.cdiv(out_features, block_n))

    x_spec = pl.BlockSpec((block_m, block_k), lambda i, k, j: (i, k))
    w0_spec = pl.BlockSpec((block_k, rank), lambda i, k, j: (k, 0))
    w1_spec = pl.BlockSpec((rank, block_n), lambda i, k, j: (0, j))
    o_spec = pl.BlockSpec((block_m, block_n), lambda i, k, j: (i, j))

    in_specs = [x_spec, w0_spec, w1_spec]
    args = [x2, w0, w1]
    if has_bias:
        in_specs.append(pl.BlockSpec((1, block_n), lambda i, k, j: (0, j)))
        args.append(bias.reshape(1, out_features))

    x_itemsize = jnp.dtype(x.dtype).itemsize
    w_itemsize = jnp.dtype(w0.dtype).itemsize
    # No recompute of x @ w0 across N tiles anymore, so this estimate matches
    # the actual schedule.
    cost = pl.CostEstimate(
        flops=2 * m * (in_features * rank + rank * out_features),
        transcendentals=0,
        bytes_accessed=(x_itemsize * m * (in_features + out_features)
                        + w_itemsize * (in_features * rank + rank * out_features)
                        + (w_itemsize * out_features if has_bias else 0)),
    )

    headroom = 8 * 1024 * 1024
    vmem_limit = int(min(capacity - headroom,
                         max(tile_total + headroom, 32 * 1024 * 1024)))
    vmem_limit = max(vmem_limit, int(tile_total))  # never below the footprint

    compiler_params = pltpu.CompilerParams(
        # k/j must run sequentially on one core (t scratch is carried across
        # them); the row axis provides the megacore parallelism.
        dimension_semantics=("parallel", "arbitrary", "arbitrary"),
        vmem_limit_bytes=vmem_limit,
    )

    out = pl.pallas_call(
        _make_low_rank_kernel(has_bias),
        out_shape=jax.ShapeDtypeStruct((m, out_features), x.dtype),
        grid_spec=pltpu.PrefetchScalarGridSpec(
            num_scalar_prefetch=0,
            grid=grid,
            in_specs=in_specs,
            out_specs=o_spec,
            scratch_shapes=[pltpu.VMEM((block_m, rank), jnp.float32)],
        ),
        compiler_params=compiler_params,
        cost_estimate=cost,
    )(*args)

    return out.reshape(*lead, out_features)


# ----------------------------------------------------------------------------
# Demo / self-check
# ----------------------------------------------------------------------------
def _rel_err(a, b):
    a = jnp.asarray(a, jnp.float32)
    b = jnp.asarray(b, jnp.float32)
    return float(jnp.linalg.norm(a - b) / (jnp.linalg.norm(b) + 1e-30))


if __name__ == "__main__":
    # Small shapes consistent with the module: x (batch=2, seq=8, in=32),
    # rank=4, out=32; parameters randn-like (nn.Parameter(torch.randn(...))).
    in_features, out_features, rank = 32, 32, 4
    batch, seq = 2, 8

    key = jax.random.PRNGKey(0)
    kx, k0, k1, kb, kr, k2 = jax.random.split(key, 6)
    x = jax.random.normal(kx, (batch, seq, in_features), dtype=jnp.float32)
    w0 = jax.random.normal(k0, (in_features, rank), dtype=jnp.float32)
    w1 = jax.random.normal(k1, (rank, out_features), dtype=jnp.float32)
    bias = jax.random.normal(kb, (out_features,), dtype=jnp.float32)

    # 1) bias path.
    y = low_rank_linear(x, w0, w1, bias)
    jax.block_until_ready(y)
    y_ref = jnp.matmul(jnp.matmul(x, w0), w1) + bias
    assert y.shape == (batch, seq, out_features)
    assert _rel_err(y, y_ref) < 2e-2

    # 2) bias=False path.
    y_nb = low_rank_linear(x, w0, w1, None)
    jax.block_until_ready(y_nb)
    assert _rel_err(y_nb, jnp.matmul(jnp.matmul(x, w0), w1)) < 2e-2

    # 3) Ragged M (M=21) exercises the clipped final row block.
    xr = jax.random.normal(kr, (3, 7, in_features), dtype=jnp.float32)
    yr = low_rank_linear(xr, w0, w1, bias)
    jax.block_until_ready(yr)
    assert _rel_err(yr, jnp.matmul(jnp.matmul(xr, w0), w1) + bias) < 2e-2

    # 4) Forced K tiling (accumulator path) and forced N tiling (t-reuse path)
    #    on a slightly larger problem, checked against plain JAX.
    in2, out2, r2, m2 = 256, 384, 8, 40
    ka, kb2, kc, kd = jax.random.split(k2, 4)
    x2 = jax.random.normal(ka, (m2, in2), dtype=jnp.float32)
    w0b = jax.random.normal(kb2, (in2, r2), dtype=jnp.float32) * 0.1
    w1b = jax.random.normal(kc, (r2, out2), dtype=jnp.float32) * 0.1
    bb = jax.random.normal(kd, (out2,), dtype=jnp.float32)
    y2_ref = jnp.matmul(jnp.matmul(x2, w0b), w1b) + bb
    # K tiled (block_k < in_features forces an untiled N axis internally).
    y2k = low_rank_linear(x2, w0b, w1b, bb, block_m=16, block_k=128)
    jax.block_until_ready(y2k)
    assert _rel_err(y2k, y2_ref) < 2e-2
    # N tiled (the t scratch is reused across the three 128-lane output tiles).
    y2n = low_rank_linear(x2, w0b, w1b, bb, block_m=16, block_n=128)
    jax.block_until_ready(y2n)
    assert _rel_err(y2n, y2_ref) < 2e-2

    # 5) bf16 path (looser tolerance: the (block_m, rank) intermediate is cast
    #    back to bf16 before the second matmul).
    xb = x.astype(jnp.bfloat16)
    w0h = w0.astype(jnp.bfloat16)
    w1h = w1.astype(jnp.bfloat16)
    bh = bias.astype(jnp.bfloat16)
    yb = low_rank_linear(xb, w0h, w1h, bh)
    jax.block_until_ready(yb)
    yb_ref = (jnp.matmul(jnp.matmul(xb.astype(jnp.float32),
                                    w0h.astype(jnp.float32)),
                         w1h.astype(jnp.float32)) + bh.astype(jnp.float32))
    assert _rel_err(yb, yb_ref) < 5e-2

    print("KERNEL_OK")
</pallas_src>

<mosaic_0001>
module attributes {stable_mosaic.version = 11 : i64} {
  func.func @kernel(%arg0: i32, %arg1: i32, %arg2: i32, %arg3: memref<8x32xf32, #tpu.memory_space<vmem>>, %arg4: memref<32x4xf32, #tpu.memory_space<vmem>>, %arg5: memref<4x32xf32, #tpu.memory_space<vmem>>, %arg6: memref<1x32xf32, #tpu.memory_space<vmem>>, %arg7: memref<8x32xf32, #tpu.memory_space<vmem>>, %arg8: memref<8x4xf32, #tpu.memory_space<vmem>>) attributes {dimension_semantics = [#tpu.dimension_semantics<parallel>, #tpu.dimension_semantics<arbitrary>, #tpu.dimension_semantics<arbitrary>], iteration_bounds = array<i64: 2, 1, 1>, scalar_prefetch = 0 : i64, scratch_operands = 1 : i64, tpu.core_type = #tpu.core_type<tc>, window_params = [{transform_indices = @transform_0, window_bounds = array<i64: 8, 32>}, {transform_indices = @transform_1, window_bounds = array<i64: 32, 4>}, {transform_indices = @transform_2, window_bounds = array<i64: 4, 32>}, {transform_indices = @transform_3, window_bounds = array<i64: 1, 32>}, {transform_indices = @transform_4, window_bounds = array<i64: 8, 32>}]} {
    %c0_i32 = arith.constant 0 : i32
    %0 = arith.cmpi eq, %arg1, %c0_i32 : i32
    %c0_i32_0 = arith.constant 0 : i32
    %1 = arith.cmpi eq, %arg2, %c0_i32_0 : i32
    %2 = arith.andi %0, %1 : i1
    %3 = arith.extui %2 : i1 to i32
    %c0_i32_1 = arith.constant 0 : i32
    %4 = arith.cmpi ne, %3, %c0_i32_1 : i32
    scf.if %4 {
      %cst = arith.constant 0.000000e+00 : f32
      %11 = vector.broadcast %cst : f32 to vector<8x4xf32>
      %c0 = arith.constant 0 : index
      %c0_6 = arith.constant 0 : index
      %12 = vector.load %arg8[%c0, %c0_6] : memref<8x4xf32, #tpu.memory_space<vmem>>, vector<8x4xf32>
      tpu.vector_store %arg8[%c0, %c0_6], %11 {strides = array<i32>} : memref<8x4xf32, #tpu.memory_space<vmem>>, vector<8x4xf32>,
    } else {
    }
    %c0_i32_2 = arith.constant 0 : i32
    %5 = arith.cmpi eq, %arg2, %c0_i32_2 : i32
    %6 = arith.extui %5 : i1 to i32
    %c0_i32_3 = arith.constant 0 : i32
    %7 = arith.cmpi ne, %6, %c0_i32_3 : i32
    scf.if %7 {
      %c0 = arith.constant 0 : index
      %c0_6 = arith.constant 0 : index
      %11 = vector.load %arg8[%c0, %c0_6] : memref<8x4xf32, #tpu.memory_space<vmem>>, vector<8x4xf32>
      %c0_7 = arith.constant 0 : index
      %c0_8 = arith.constant 0 : index
      %12 = vector.load %arg3[%c0_7, %c0_8] : memref<8x32xf32, #tpu.memory_space<vmem>>, vector<8x32xf32>
      %c0_9 = arith.constant 0 : index
      %c0_10 = arith.constant 0 : index
      %13 = vector.load %arg4[%c0_9, %c0_10] : memref<32x4xf32, #tpu.memory_space<vmem>>, vector<32x4xf32>
      %cst = arith.constant dense<0.000000e+00> : vector<8x4xf32>
      %14 = tpu.matmul %12, %13, %cst {dimension_numbers = #tpu.dot_dimension_numbers<[1], [0], [0], [1], [0, 0, 1, 1], [], []>} : vector<8x32xf32>, vector<32x4xf32>, vector<8x4xf32> -> vector<8x4xf32>
      %15 = arith.addf %11, %14 : vector<8x4xf32>
      %c0_11 = arith.constant 0 : index
      %c0_12 = arith.constant 0 : index
      %16 = vector.load %arg8[%c0_11, %c0_12] : memref<8x4xf32, #tpu.memory_space<vmem>>, vector<8x4xf32>
      tpu.vector_store %arg8[%c0_11, %c0_12], %15 {strides = array<i32>} : memref<8x4xf32, #tpu.memory_space<vmem>>, vector<8x4xf32>,
    } else {
    }
    %c0_i32_4 = arith.constant 0 : i32
    %8 = arith.cmpi eq, %arg1, %c0_i32_4 : i32
    %9 = arith.extui %8 : i1 to i32
    %c0_i32_5 = arith.constant 0 : i32
    %10 = arith.cmpi ne, %9, %c0_i32_5 : i32
    scf.if %10 {
      %c0 = arith.constant 0 : index
      %c0_6 = arith.constant 0 : index
      %11 = vector.load %arg8[%c0, %c0_6] : memref<8x4xf32, #tpu.memory_space<vmem>>, vector<8x4xf32>
      %c0_7 = arith.constant 0 : index
      %c0_8 = arith.constant 0 : index
      %12 = vector.load %arg5[%c0_7, %c0_8] : memref<4x32xf32, #tpu.memory_space<vmem>>, vector<4x32xf32>
      %cst = arith.constant dense<0.000000e+00> : vector<8x32xf32>
      %13 = tpu.matmul %11, %12, %cst {dimension_numbers = #tpu.dot_dimension_numbers<[1], [0], [0], [1], [0, 0, 1, 1], [], []>} : vector<8x4xf32>, vector<4x32xf32>, vector<8x32xf32> -> vector<8x32xf32>
      %c0_9 = arith.constant 0 : index
      %c0_10 = arith.constant 0 : index
      %14 = vector.load %arg6[%c0_9, %c0_10] : memref<1x32xf32, #tpu.memory_space<vmem>>, vector<1x32xf32>
      %15 = vector.broadcast %14 : vector<1x32xf32> to vector<8x32xf32>
      %16 = arith.addf %13, %15 : vector<8x32xf32>
      %c0_11 = arith.constant 0 : index
      %c0_12 = arith.constant 0 : index
      %17 = vector.load %arg7[%c0_11, %c0_12] : memref<8x32xf32, #tpu.memory_space<vmem>>, vector<8x32xf32>
      tpu.vector_store %arg7[%c0_11, %c0_12], %16 {strides = array<i32>} : memref<8x32xf32, #tpu.memory_space<vmem>>, vector<8x32xf32>,
    } else {
    }
    return
  }
  func.func @transform_0(%arg0: i32, %arg1: i32, %arg2: i32) -> (i32, i32) {
    %c0_i32 = arith.constant 0 : i32
    return %arg0, %arg1 : i32, i32
  }
  func.func @transform_1(%arg0: i32, %arg1: i32, %arg2: i32) -> (i32, i32) {
    %c0_i32 = arith.constant 0 : i32
    %c0_i32_0 = arith.constant 0 : i32
    return %arg1, %c0_i32 : i32, i32
  }
  func.func @transform_2(%arg0: i32, %arg1: i32, %arg2: i32) -> (i32, i32) {
    %c0_i32 = arith.constant 0 : i32
    %c0_i32_0 = arith.constant 0 : i32
    return %c0_i32, %arg2 : i32, i32
  }
  func.func @transform_3(%arg0: i32, %arg1: i32, %arg2: i32) -> (i32, i32) {
    %c0_i32 = arith.constant 0 : i32
    %c0_i32_0 = arith.constant 0 : i32
    return %c0_i32, %arg2 : i32, i32
  }
  func.func @transform_4(%arg0: i32, %arg1: i32, %arg2: i32) -> (i32, i32) {
    %c0_i32 = arith.constant 0 : i32
    return %arg0, %arg2 : i32, i32
  }
}

</mosaic_0001>

<bundles_post_ra>
// kernel: low_rank_linear.1
= control target key start
LH: loop header
LB: loop body
LE: loop exit
PB: predicated region body
PF: predicated region fallthrough
CT: control target
= control target key end

     0   :  { %9 = vsyncpa [#allocation4], 0  ;;  %s944_s0 = inlined_call_operand.vmem [shape: f32[16,32], index: 0, kind: input, shape index: {}]   ;;  %s945_s1 = inlined_call_operand.vmem [shape: f32[32,4], index: 1, kind: input, shape index: {}]   ;;  %s946_s2 = inlined_call_operand.vmem [shape: f32[4,32], index: 2, kind: input, shape index: {}]   ;;  %s947_s3 = inlined_call_operand.vmem [shape: f32[1,32], index: 3, kind: input, shape index: {}]   ;;  %s948_s4 = inlined_call_operand.hbm [shape: f32[16,32], index: 4, kind: output, shape index: {}]  }
   0x1   :  { %11 = vsyncpa [#allocation4 + $0x1], 0  ;;  %s809_s15 = smov 0   ;;  %s811_s16 = smov 0  }
   0x2   :  { %s813_s17 = smov 0   ;;  %s815_s18 = smov 0  }
   0x3   :  { %s817_s19 = smov 0   ;;  %s819_s20 = smov 0  }
   0x4 LB: > { %s595_s21 = sadd.s32 4294967295, %s778_s20   ;;  %s596_s22 = sadd.s32 4294967294, %s778_s20   ;;  %s778_s20 = sphi %s819_s20, %s17_s20   ;;  %s774_s19 = sphi %s817_s19, %s955_s19   ;;  %s770_s18 = sphi %s815_s18, %s954_s18   ;;  %s766_s17 = sphi %s813_s17, %s953_s17   ;;  %s762_s16 = sphi %s811_s16, %s952_s16   ;;  %s758_s15 = sphi %s809_s15, %s951_s15  }
   0x5   : > { %s36_s23 = sadd.s32 1, %s774_s19  ;;  %s151_s24 = sadd.s32 1, %s766_s17 }
   0x6   : > { %p38_p0 = scmp.ge.s32.totalorder %s36_s23, 2  ;;  %p161_p1 = scmp.ne.s32.totalorder %s766_s17, %s762_s16 }
   0x7   : > { %p162_p2 = scmp.eq.s32.totalorder %s595_s21, 1  ;;  %p167_p3 = scmp.ne.s32.totalorder %s762_s16, %s758_s15 }
   0x8   : > { %s957_s23 = smov (%p38_p0, %s36_s23), 0  ;;  %p168_p5 = scmp.eq.s32.totalorder %s596_s22, 1 }
   0x9   : > { %p849_p4 = por %p162_p2, %p161_p1  ;;  %s146_s26 = ssub.s32 %s774_s19, %s957_s23 }
   0xa   : > { %p602_p6 = scmp.ge.s32.totalorder %s778_s20, 1  ;;  %p149_p7 = scmp.eq.s32.totalorder %s146_s26, 0 }
   0xb   : > { %p856_p8 = por %p168_p5, %p167_p3  ;;  %p218_p9 = scmp.lt.s32.totalorder %s778_s20, 3 }
   0xc   : > { %s862_s28 = scalar_select %p149_p7, %s766_s17, %s151_s24  }
   0xd   : > { %p219_p10 = pnand %p602_p6, %p218_p9 }
   0xe   : > { %v291_v0 = vld [vmem:[%s945_s1] sm:$0xff] (!%p219_p10)  ;;  %v292_v1 = vld [vmem:[%s945_s1 + $0x8] sm:$0xff] (!%p219_p10)  ;;  %v293_v2 = vld [vmem:[%s945_s1 + $0x10] sm:$0xff] (!%p219_p10)  ;;  %v780_v3 = vmov (!%p219_p10), 0.0|0.0   ;;  %vm781_vm0 = vmmov (!%p219_p10), 0   ;;  %v782_v6 = vmov (!%p219_p10), 0.0  }
   0xf   : > { %222 = sbr.rel (%p219_p10) target bundleno = 477 (0x1dd), region = 36  ;;  %636 = vmatprep.subr.bf16.mxu0 (!%p219_p10), %v780_v3  ;;  %v637_v4 = vpack.c.bf16 (!%p219_p10), %v292_v1, %v291_v0  ;;  %v294_v5 = vld [vmem:[%s945_s1 + $0x18] sm:$0xff] (!%p219_p10)  ;;  %628 = vmatprep.mubr.msk.f32.mxu0 (!%p219_p10), %vm781_vm0, %v782_v6  ;;  %p258_p11 = scmp.lt.s32.totalorder (!%p219_p10), %s770_s18, 1  ;;  %vm284_vm1 = vcmask (!%p219_p10), 31744   ;;  %vm295_vm2 = vcmask (!%p219_p10), 261120   ;;  %vm388_vm3 = vcmask (!%p219_p10), 1043456  }
  0x10   : > { %285 = vst.msk [vmem:[#allocation2] sm:$0xff] (!%p219_p10), %vm284_vm1, %v782_v6  ;;  %631 = vmatprep.subr.mxu1 (!%p219_p10), %v782_v6  ;;  %633 = vmatprep.mubr.msk.f32.mxu1 (!%p219_p10), %vm781_vm0, %v782_v6  ;;  %v640_v7 = vpack.c.bf16 (!%p219_p10), %v294_v5, %v293_v2  ;;  %v376_v9 = vld [vmem:[%s946_s2] sm:$0xf] (!%p219_p10)  ;;  %s255_s26 = sand.u32 (!%p219_p10), 1, %s762_s16   ;;  %s610_s6 = sshll.u32 (!%p219_p10), %s770_s18, 7 }
  0x11   : > { %638 = vmatpush3.bf16.msra.mxu0 (!%p219_p10), %v637_v4  ;;  %632 = vmatpush3.msk.msra.mxu1 (!%p219_p10), %vm388_vm3, %v376_v9  ;;  %s603_s29 = sshll.u32 (!%p219_p10), %s255_s26, 3  ;;  %v606_v15 = vld [vmem:[%s947_s3] ss:$0 sm:$0xff] (!%p219_p10) }
  0x12   : > { %639 = vmatprep.subr.bf16.mxu0 (!%p219_p10), %v780_v3  ;;  %s257_s7 = scalar_lea.vmem (!%p219_p10), [#allocation3], %s603_s29 }
  0x13   : > { %s479_s8 = sshll.u32 (!%p219_p10), %s257_s7, 4  ;;  %s898_s8 = int_to_ptr.vmem [resolvable:$true] %s479_s8 }
  0x14   : > { %s700_s13 = scalar_lea.vmem (!%p219_p10), %s898_s8, 128 }
  0x15   : > { %641 = vmatpush3.bf16.msra.mxu0 (!%p219_p10), %v640_v7  ;;  %p701_p12 = scmp.ne.s32.totalorder (!%p219_p10), %s898_s8, %s700_s13 }
  0x16   : > { %s259_s11 = scalar_select %p258_p11, %s770_s18, 1 }
  0x17   : > { %v289_v10 = vld [vmem:[#allocation2] sm:$0xff]  ;;  %p702_p13 = pnand %p701_p12, %p849_p4  ;;  %s783_s18 = smov [#allocation3]  }
  0x18   : > { %s604_s12 = sshll.u32 %s259_s11, 3  ;;  %s896_s11 = scalar_lea.hbm %s948_s4, %s610_s6 }
  0x19   : > { %s264_s21 = scalar_lea.vmem %s944_s0, %s604_s12  ;;  %s465_s12 = scalar_lea.sflag [#allocation4], %s255_s26 }
  0x1a   : > { %v290_v8 = vld [vmem:[%s264_s21] sm:$0xff]  ;;  %p703_p0 = pneg %p702_p13  ;;  %s704_s14 = sshll.u32 %s783_s18, 4  ;;  %s705_s14 = int_to_ptr.vmem [resolvable:$false] %s704_s14 }
  0x1b   : > { %629 = vmatmul.mubr.msk.f32.vlgmr.msra.gmra.mrb[0].mxu0 %vm295_vm2, %v290_v8  ;;  %s706_s21 = scalar_lea.vmem %s705_s14, 256  ;;  %p707_p1 = scmp.lt.s32.totalorder %s898_s8, %s705_s14 }
  0x1c   : > { %p708_p2 = scmp.lt.s32.totalorder %s706_s21, %s700_s13 }
  0x1e   : > { %p709_p3 = por %p708_p2, %p707_p1 }
  0x20   : > { %p710_p5 = pnand %p709_p3, %p703_p0 }
  0xee   : > { %v365_v11 = vpop.f32.mrb[0].mxu0 }
  0xef   : > { %v369_v12 = vadd.f32 %v365_v11, %v289_v10  ;;  %v630_v13 = vpop.f32.mrb[1].mxu0 }
  0xf1   : > { %371 = vst.msk [vmem:[#allocation2] sm:$0xff] %vm284_vm1, %v369_v12 }
  0xf8   : > { %v375_v14 = vld [vmem:[#allocation2] sm:$0xff] }
  0xf9   : > { %634 = vmatmul.mubr.msk.f32.vlgmr.msra.gmra.mrb[0].mxu1 %vm284_vm1, %v375_v14 }
 0x1cc   : > { %v458_v16 = vpop.f32.mrb[0].mxu1 }
 0x1cd   : > { %v459_v17 = vadd.f32 %v606_v15, %v458_v16  ;;  %v635_v18 = vpop.f32.mrb[1].mxu1 }
 0x1cf   : > { %463 = vst.msk [vmem:[%s257_s7] sm:$0xff] %vm295_vm2, %v459_v17 }
 0x1d0   : > { %713 = shalt.err (!%p710_p5)
}
 0x1d1   : > { %s714_s22 = scalar_lea.hbm %s896_s11, 128  ;;  %s718_s29 = scalar_lea.hbm %s948_s4, 256 }
 0x1d2   : > { %p715_p6 = scmp.ne.s32.totalorder %s896_s11, %s714_s22  ;;  %p719_p10 = scmp.lt.u32.totalorder %s896_s11, %s948_s4 }
 0x1d3   : > { %p720_p11 = scmp.lt.u32.totalorder %s718_s29, %s714_s22  ;;  %p722_p13 = scmp.lt.u32.totalorder %s714_s22, %s896_s11 }
 0x1d4   : > { %p716_p7 = pnand %p715_p6, %p849_p4 }
 0x1d5   : > { %p721_p12 = por %p720_p11, %p719_p10 }
 0x1d6   : > { %p717_p9 = pneg %p716_p7 }
 0x1d7   : > { %p723_p0 = por %p722_p13, %p721_p12 }
 0x1d9   : > { %p724_p1 = pnand %p723_p0, %p717_p9 }
 0x1db   : > { %727 = shalt.err (!%p724_p1)
}
 0x1dc   : > { %642 = dma.vmem_to_hbm [thread:$0]  (%p849_p4), %s898_s8, 128, %s896_s11, %s465_s12  }
 0x1dd PF: > { %p648_p2 = scmp.ge.s32.totalorder %s778_s20, 2  ;;  %s491_s6 = sand.u32 1, %s758_s15  }
 0x1de   : > { %s492_s7 = scalar_lea.sflag [#allocation4], %s491_s6 }
 0x1df   : > { %p645_p3 = pnand %p648_p2, %p856_p8 }
 0x1e1   : > { %753 = dma.done.wait (!%p645_p3), %s492_s7, 128  }
 0x1e2   : > { %755 = vsyncadd (!%p645_p3), %s492_s7, 4294967168  ;;  %s17_s20 = sadd.s32 1, %s778_s20   ;;  %s951_s15 = smov %s762_s16 }
 0x1e3   : > { %p14_p5 = scmp.ge.s32.totalorder %s17_s20, 4   ;;  %s952_s16 = smov %s766_s17 }
 0x1e4   : > { %s953_s17 = smov %s862_s28  ;;  %s954_s18 = smov %s774_s19 }
 0x1e5   : > { %s955_s19 = smov %s957_s23  ;;  %16 = sbr.rel (!%p14_p5) target bundleno = 4 (0x4), region = 92 }
 0x1ec   :  { %497 = vsyncpa [#allocation4], 1 }
 0x1ed   :  { %499 = vsyncpa [#allocation4 + $0x1], 1 }

</bundles_post_ra>
